<compile_context>
chip_gen: v7x
topology: tpu7x:2x2x1
jax: 0.10.0
libtpu: 0.0.40
codegen_flags: <defaults>
</compile_context>

<pallas_src>
import jax
import jax.numpy as jnp
from jax.experimental import pallas as pl
from jax.experimental.pallas import tpu as pltpu


def _round_up(a, b):
    return (a + b - 1) // b * b


def _patch_embed_kernel(x_ref, w_ref, b_ref, o_ref):
    # x_ref: [tm, Kp] (compute dtype)   w_ref: [Kp, tn] (compute dtype)
    # b_ref: [1, tn]  (f32)             o_ref: [tm, tn] (out dtype)
    acc = jnp.dot(x_ref[...], w_ref[...], preferred_element_type=jnp.float32)
    o_ref[...] = (acc + b_ref[...]).astype(o_ref.dtype)


def patch_embed(x, weight, bias, patch_size, *,
                compute_dtype=jnp.bfloat16,    # f32 escape hatch available
                out_dtype=None,                # default: x.dtype (module semantics);
                                               # pass bf16 to halve the HBM writeback
                tm_max=1024,
                mxu_align=256,
                vmem_budget_bytes=40 * 1024 * 1024):
    """x: [B, C, H, W] (NCHW), weight: [E, C, p, p], bias: [E] -> [B, Np, E]."""
    B, C, H, W = x.shape
    E = weight.shape[0]
    p = patch_size
    Hp, Wp = H // p, W // p
    Np = Hp * Wp
    out_dtype = x.dtype if out_dtype is None else out_dtype

    # ---- Glue: extract non-overlapping patches -> X[M, K] (crop matches VALID conv).
    # Cast to compute dtype *first* so the transpose shuffles half the bytes.
    xc = x[:, :, : Hp * p, : Wp * p].astype(compute_dtype)
    xp = xc.reshape(B, C, Hp, p, Wp, p)
    xp = jnp.transpose(xp, (0, 2, 4, 1, 3, 5))            # [B, Hp, Wp, C, p, p]
    xp = xp.reshape(B * Np, C * p * p)                    # [M, K]

    # ---- Glue: weight [E, C, p, p] -> [K, E] so Y = X @ W matches the conv.
    w_mat = jnp.transpose(weight.reshape(E, C * p * p)).astype(compute_dtype)  # [K, E]

    M, K = xp.shape

    # ---- MXU / lane-friendly padding (256-granular K and E). ----
    Kp = _round_up(K, mxu_align)
    Ep = _round_up(E, mxu_align)

    cbytes = jnp.dtype(compute_dtype).itemsize
    obytes = jnp.dtype(out_dtype).itemsize

    def footprint(tm, tn):
        # Double-buffered X, W, bias (sublane-padded), and output tiles.
        return 2 * (tm * Kp * cbytes + Kp * tn * cbytes + 8 * tn * 4 + tm * tn * obytes)

    # ---- Tile selection: cover all of E with one tile so X is read exactly once and
    # W stays resident; use a large 256-aligned M tile. Shrink only on VMEM pressure.
    tm = min(tm_max, _round_up(M, mxu_align))
    tn = Ep
    if footprint(tm, tn) > vmem_budget_bytes:
        tn = mxu_align                                     # fall back to tiling E
        while footprint(tm, tn) > vmem_budget_bytes and tm > mxu_align:
            tm -= mxu_align
    Mp = _round_up(M, tm)

    x_p = jnp.pad(xp, ((0, Mp - M), (0, Kp - K)))
    w_p = jnp.pad(w_mat, ((0, Kp - K), (0, Ep - E)))
    b_p = jnp.pad(bias.astype(jnp.float32), (0, Ep - E)).reshape(1, Ep)

    n_eblk = Ep // tn
    grid = (n_eblk, Mp // tm)  # M innermost -> W / bias blocks stay VMEM-resident

    vmem_limit = min(footprint(tm, tn) + (8 << 20), 48 << 20)

    cost = pl.CostEstimate(
        flops=2 * Mp * Kp * Ep,
        transcendentals=0,
        bytes_accessed=(x_p.size * cbytes * n_eblk      # X re-read once per E block
                        + w_p.size * cbytes
                        + b_p.size * 4
                        + Mp * Ep * obytes),
    )

    out = pl.pallas_call(
        _patch_embed_kernel,
        out_shape=jax.ShapeDtypeStruct((Mp, Ep), out_dtype),
        grid_spec=pltpu.PrefetchScalarGridSpec(
            num_scalar_prefetch=0,
            grid=grid,
            in_specs=[
                pl.BlockSpec((tm, Kp), lambda j, i: (i, 0)),   # X tile (streamed)
                pl.BlockSpec((Kp, tn), lambda j, i: (0, j)),   # W tile (resident over M)
                pl.BlockSpec((1, tn), lambda j, i: (0, j)),    # bias tile (resident)
            ],
            out_specs=pl.BlockSpec((tm, tn), lambda j, i: (i, j)),
        ),
        compiler_params=pltpu.CompilerParams(
            dimension_semantics=("parallel", "parallel"),
            vmem_limit_bytes=int(vmem_limit),
            # Let XLA fuse the pad/convert (and ideally the patch transpose) into the
            # kernel's X read instead of materializing a separate padded copy in HBM.
            allow_input_fusion=[True, False, False],
        ),
        cost_estimate=cost,
    )(x_p, w_p, b_p)

    if Mp != M or Ep != E:
        out = out[:M, :E]
    return out.reshape(B, Np, E)


def _reference(x, weight, bias, patch_size):
    # Pure-JAX reference using a real strided convolution (NCHW / OIHW), f32.
    y = jax.lax.conv_general_dilated(
        x, weight,
        window_strides=(patch_size, patch_size),
        padding="VALID",
        dimension_numbers=("NCHW", "OIHW", "NCHW"),
    ) + bias.reshape(1, -1, 1, 1)
    B, Cc, Hh, Ww = y.shape
    return jnp.transpose(y.reshape(B, Cc, Hh * Ww), (0, 2, 1))


if __name__ == "__main__":
    # Small shapes consistent with the module: patch_size=7 (module default), spatial 16x16.
    B, C, H, W = 2, 4, 16, 16
    E = 32
    p = 7

    key = jax.random.PRNGKey(0)
    kx, kw, kb = jax.random.split(key, 3)
    x = jax.random.normal(kx, (B, C, H, W), dtype=jnp.float32)
    weight = jax.random.normal(kw, (E, C, p, p), dtype=jnp.float32) * 0.02
    bias = jax.random.normal(kb, (E,), dtype=jnp.float32) * 0.02

    out = patch_embed(x, weight, bias, p)
    out = jax.block_until_ready(out)

    ref = jax.block_until_ready(_reference(x, weight, bias, p))
    Hp, Wp = H // p, W // p
    assert out.shape == (B, Hp * Wp, E), out.shape
    # bf16 inputs with f32 accumulation -> slightly relaxed tolerance vs the f32 conv ref.
    assert jnp.allclose(out, ref, atol=2e-2, rtol=2e-2), "mismatch vs conv reference"

    print("KERNEL_OK")
</pallas_src>

<mosaic_0001>
module attributes {stable_mosaic.version = 11 : i64} {
  func.func @_patch_embed_kernel(%arg0: i32, %arg1: i32, %arg2: memref<256x256xbf16, #tpu.memory_space<vmem>>, %arg3: memref<256x256xbf16, #tpu.memory_space<vmem>>, %arg4: memref<1x256xf32, #tpu.memory_space<vmem>>, %arg5: memref<256x256xf32, #tpu.memory_space<vmem>>) attributes {dimension_semantics = [#tpu.dimension_semantics<parallel>, #tpu.dimension_semantics<parallel>], iteration_bounds = array<i64: 1, 1>, scalar_prefetch = 0 : i64, scratch_operands = 0 : i64, tpu.core_type = #tpu.core_type<tc>, window_params = [{transform_indices = @transform_0, window_bounds = array<i64: 256, 256>}, {transform_indices = @transform_1, window_bounds = array<i64: 256, 256>}, {transform_indices = @transform_2, window_bounds = array<i64: 1, 256>}, {transform_indices = @transform_3, window_bounds = array<i64: 256, 256>}]} {
    %c0 = arith.constant 0 : index
    %c0_0 = arith.constant 0 : index
    %0 = vector.load %arg2[%c0, %c0_0] : memref<256x256xbf16, #tpu.memory_space<vmem>>, vector<256x256xbf16>
    %c0_1 = arith.constant 0 : index
    %c0_2 = arith.constant 0 : index
    %1 = vector.load %arg3[%c0_1, %c0_2] : memref<256x256xbf16, #tpu.memory_space<vmem>>, vector<256x256xbf16>
    %cst = arith.constant dense<0.000000e+00> : vector<256x256xf32>
    %2 = tpu.matmul %0, %1, %cst {dimension_numbers = #tpu.dot_dimension_numbers<[1], [0], [0], [1], [0, 0, 1, 1], [], []>} : vector<256x256xbf16>, vector<256x256xbf16>, vector<256x256xf32> -> vector<256x256xf32>
    %c0_3 = arith.constant 0 : index
    %c0_4 = arith.constant 0 : index
    %3 = vector.load %arg4[%c0_3, %c0_4] : memref<1x256xf32, #tpu.memory_space<vmem>>, vector<1x256xf32>
    %4 = vector.broadcast %3 : vector<1x256xf32> to vector<256x256xf32>
    %5 = arith.addf %2, %4 : vector<256x256xf32>
    %c0_5 = arith.constant 0 : index
    %c0_6 = arith.constant 0 : index
    %6 = vector.load %arg5[%c0_5, %c0_6] : memref<256x256xf32, #tpu.memory_space<vmem>>, vector<256x256xf32>
    tpu.vector_store %arg5[%c0_5, %c0_6], %5 {strides = array<i32>} : memref<256x256xf32, #tpu.memory_space<vmem>>, vector<256x256xf32>,
    return
  }
  func.func @transform_0(%arg0: i32, %arg1: i32) -> (i32, i32) {
    %c0_i32 = arith.constant 0 : i32
    %c0_i32_0 = arith.constant 0 : i32
    return %arg1, %c0_i32 : i32, i32
  }
  func.func @transform_1(%arg0: i32, %arg1: i32) -> (i32, i32) {
    %c0_i32 = arith.constant 0 : i32
    %c0_i32_0 = arith.constant 0 : i32
    return %c0_i32, %arg0 : i32, i32
  }
  func.func @transform_2(%arg0: i32, %arg1: i32) -> (i32, i32) {
    %c0_i32 = arith.constant 0 : i32
    %c0_i32_0 = arith.constant 0 : i32
    return %c0_i32, %arg0 : i32, i32
  }
  func.func @transform_3(%arg0: i32, %arg1: i32) -> (i32, i32) {
    %c0_i32 = arith.constant 0 : i32
    return %arg1, %arg0 : i32, i32
  }
}

</mosaic_0001>

<bundles_post_ra>
// kernel: tpu_custom_call.1
= control target key start
LH: loop header
LB: loop body
LE: loop exit
PB: predicated region body
PF: predicated region fallthrough
CT: control target
= control target key end

     0   :  { %8 = vsyncpa [#allocation3], 0  ;;  %s1119_s0 = inlined_call_operand.hbm [shape: bf16[256,256], index: 0, kind: input, shape index: {}]   ;;  %s1120_s1 = inlined_call_operand.hbm [shape: bf16[256,256], index: 1, kind: input, shape index: {}]   ;;  %s1121_s2 = inlined_call_operand.vmem [shape: f32[1,256], index: 2, kind: input, shape index: {}]   ;;  %s1122_s3 = inlined_call_operand.hbm [shape: f32[256,256], index: 3, kind: output, shape index: {}]  }
   0x1   :  { %9 = vsyncpa [#allocation6], 0 }
   0x2   :  { %10 = vsyncpa [#allocation4], 0  ;;  %s985_s12 = smov [#allocation2]   ;;  %s913_s16 = scalar_lea.hbm %s1119_s0, 4096 }
   0x3   :  { %s16_s13 = sshll.u32 %s985_s12, 4  ;;  %p914_p0 = scmp.ne.s32.totalorder %s1119_s0, %s913_s16  ;;  %s17_s13 = int_to_ptr.vmem [resolvable:$true] %s16_s13 }
   0x4   :  { %p917_p1 = scmp.lt.u32.totalorder %s913_s16, %s1119_s0 }
   0x6   :  { %p919_p2 = pnand %p917_p1, %p914_p0 }
   0x8   :  { %922 = shalt.err (!%p919_p2)
}
   0x9   :  { %s923_s21 = scalar_lea.vmem %s17_s13, 4096  ;;  %p928_p4 = scmp.lt.s32.totalorder %s17_s13, %s17_s13 }
   0xa   :  { %p924_p3 = scmp.ne.s32.totalorder %s17_s13, %s923_s21  ;;  %p929_p5 = scmp.lt.s32.totalorder %s923_s21, %s923_s21 }
   0xc   :  { %p930_p6 = por %p929_p5, %p928_p4 }
   0xe   :  { %p931_p7 = pnand %p930_p6, %p924_p3 }
  0x10   :  { %934 = shalt.err (!%p931_p7)
}
  0x11   :  { %s986_s22 = smov 128   ;;  %s987_s23 = smov 8  }
  0x12   :  { %22 = dma.hbm_to_vmem [thread:$0]  %s1119_s0, 4096, %s17_s13, [#allocation3], %s986_s22, %s986_s22, %s987_s23  }
  0x13   :  { %s988_s26 = smov [#allocation5]   ;;  %s935_s30 = scalar_lea.hbm %s1120_s1, 4096 }
  0x14   :  { %s28_s27 = sshll.u32 %s988_s26, 4  ;;  %p936_p8 = scmp.ne.s32.totalorder %s1120_s1, %s935_s30  ;;  %s29_s27 = int_to_ptr.vmem [resolvable:$true] %s28_s27 }
  0x15   :  { %p939_p9 = scmp.lt.u32.totalorder %s935_s30, %s1120_s1 }
  0x17   :  { %p941_p10 = pnand %p939_p9, %p936_p8 }
  0x19   :  { %944 = shalt.err (!%p941_p10)
}
  0x1a   :  { %s945_s8 = scalar_lea.vmem %s29_s27, 4096  ;;  %p950_p12 = scmp.lt.s32.totalorder %s29_s27, %s29_s27 }
  0x1b   :  { %p946_p11 = scmp.ne.s32.totalorder %s29_s27, %s945_s8  ;;  %p951_p13 = scmp.lt.s32.totalorder %s945_s8, %s945_s8 }
  0x1d   :  { %p952_p0 = por %p951_p13, %p950_p12 }
  0x1f   :  { %p953_p1 = pnand %p952_p0, %p946_p11 }
  0x21   :  { %956 = shalt.err (!%p953_p1)
}
  0x22   :  { %34 = dma.hbm_to_vmem [thread:$0]  %s1120_s1, 4096, %s29_s27, [#allocation6], %s986_s22, %s986_s22, %s987_s23  }
  0x23   :  { %979 = dma.done.wait [#allocation3], 4096  }
  0x24   :  { %980 = vsyncadd [#allocation3], 4294963200 }
  0x25   :  { %981 = dma.done.wait [#allocation6], 4096  }
  0x26   :  { %982 = vsyncadd [#allocation6], 4294963200  ;;  %v817_v0 = vld [vmem:[#allocation5 + $0x4] ss:$8 sps:$4 sm:$0xff]   ;;  %v819_v1 = vld [vmem:[#allocation5] ss:$8 sps:$4 sm:$0xff]  }
  0x27   :  { %439 = vmatprep.subr.bf16.mxu0 %v817_v0  ;;  %778 = vmatprep.subr.bf16.mxu1 %v817_v0  ;;  %v820_v2 = vld [vmem:[#allocation5 + $0x14] ss:$8 sps:$4 sm:$0xff]   ;;  %v822_v3 = vld [vmem:[#allocation5 + $0x10] ss:$8 sps:$4 sm:$0xff]   ;;  %v823_v4 = vld [vmem:[#allocation5 + $0x24] ss:$8 sps:$4 sm:$0xff]   ;;  %v109_v0 = vlaneseq }
  0x28   :  { %440 = vmatpush1.bf16.msra.mxu0 %v819_v1  ;;  %794 = vmatpush1.bf16.msra.mxu1 %v819_v1  ;;  %v825_v5 = vld [vmem:[#allocation5 + $0x20] ss:$8 sps:$4 sm:$0xff]   ;;  %v826_v6 = vld [vmem:[#allocation5 + $0x34] ss:$8 sps:$4 sm:$0xff]   ;;  %v828_v7 = vld [vmem:[#allocation5 + $0x30] ss:$8 sps:$4 sm:$0xff]  }
  0x29   :  { %441 = vmatprep.subr.bf16.mxu0 %v820_v2  ;;  %779 = vmatprep.subr.bf16.mxu1 %v820_v2  ;;  %v829_v8 = vld [vmem:[#allocation5 + $0x44] ss:$8 sps:$4 sm:$0xff]   ;;  %v831_v9 = vld [vmem:[#allocation5 + $0x40] ss:$8 sps:$4 sm:$0xff]   ;;  %v832_v10 = vld [vmem:[#allocation5 + $0x54] ss:$8 sps:$4 sm:$0xff]  }
  0x2a   :  { %v834_v11 = vld [vmem:[#allocation5 + $0x50] ss:$8 sps:$4 sm:$0xff]   ;;  %v835_v12 = vld [vmem:[#allocation5 + $0x64] ss:$8 sps:$4 sm:$0xff]   ;;  %v837_v14 = vld [vmem:[#allocation5 + $0x60] ss:$8 sps:$4 sm:$0xff]  }
  0x2b   :  { %v867_v13 = vld [vmem:[#allocation2 + $0x4] ss:$8 sps:$4 sm:$0xff]   ;;  %v838_v16 = vld [vmem:[#allocation5 + $0x74] ss:$8 sps:$4 sm:$0xff]   ;;  %v840_v17 = vld [vmem:[#allocation5 + $0x70] ss:$8 sps:$4 sm:$0xff]  }
  0x2c   :  { %442 = vmatpush1.bf16.msra.mxu0 %v822_v3  ;;  %795 = vmatpush1.bf16.msra.mxu1 %v822_v3  ;;  %v870_v15 = vld [vmem:[#allocation2 + $0x84] ss:$8 sps:$4 sm:$0xff]   ;;  %v843_v19 = vld [vmem:[#allocation5 + $0x80] ss:$8 sps:$4 sm:$0xff]   ;;  %v844_v20 = vld [vmem:[#allocation5 + $0x94] ss:$8 sps:$4 sm:$0xff]  }
  0x2d   :  { %443 = vmatprep.subr.bf16.mxu0 %v823_v4  ;;  %780 = vmatprep.subr.bf16.mxu1 %v823_v4  ;;  %v841_v18 = vld [vmem:[#allocation5 + $0x84] ss:$8 sps:$4 sm:$0xff]   ;;  %v846_v21 = vld [vmem:[#allocation5 + $0x90] ss:$8 sps:$4 sm:$0xff]   ;;  %v849_v23 = vld [vmem:[#allocation5 + $0xa0] ss:$8 sps:$4 sm:$0xff]  }
  0x2e   :  { %471 = vmatprep.mubr.bf16.mxu0 %v867_v13  ;;  %551 = vmatprep.mubr.bf16.mxu1 %v870_v15  ;;  %v847_v22 = vld [vmem:[#allocation5 + $0xa4] ss:$8 sps:$4 sm:$0xff]   ;;  %v850_v24 = vld [vmem:[#allocation5 + $0xb4] ss:$8 sps:$4 sm:$0xff]   ;;  %v852_v25 = vld [vmem:[#allocation5 + $0xb0] ss:$8 sps:$4 sm:$0xff]  }
  0x2f   :  { %v853_v26 = vld [vmem:[#allocation5 + $0xc4] ss:$8 sps:$4 sm:$0xff]   ;;  %v855_v27 = vld [vmem:[#allocation5 + $0xc0] ss:$8 sps:$4 sm:$0xff]   ;;  %v856_v28 = vld [vmem:[#allocation5 + $0xd4] ss:$8 sps:$4 sm:$0xff]  }
  0x30   :  { %444 = vmatpush1.bf16.msra.mxu0 %v825_v5  ;;  %796 = vmatpush1.bf16.msra.mxu1 %v825_v5  ;;  %v858_v29 = vld [vmem:[#allocation5 + $0xd0] ss:$8 sps:$4 sm:$0xff]   ;;  %v859_v30 = vld [vmem:[#allocation5 + $0xe4] ss:$8 sps:$4 sm:$0xff]   ;;  %v861_v31 = vld [vmem:[#allocation5 + $0xe0] ss:$8 sps:$4 sm:$0xff]  }
  0x31   :  { %445 = vmatprep.subr.bf16.mxu0 %v826_v6  ;;  %781 = vmatprep.subr.bf16.mxu1 %v826_v6  ;;  %v862_v32 = vld [vmem:[#allocation5 + $0xf4] ss:$8 sps:$4 sm:$0xff]   ;;  %v864_v33 = vld [vmem:[#allocation5 + $0xf0] ss:$8 sps:$4 sm:$0xff]   ;;  %v865_v34 = vld [vmem:[#allocation2] ss:$8 sps:$4 sm:$0xff]  }
  0x32   :  { %v868_v35 = vld [vmem:[#allocation2 + $0x80] ss:$8 sps:$4 sm:$0xff]   ;;  %v871_v36 = vld [vmem:[#allocation2 + $0x14] ss:$8 sps:$4 sm:$0xff]   ;;  %v875_v38 = vld [vmem:[#allocation2 + $0x10] ss:$8 sps:$4 sm:$0xff]  }
  0x33   :  { %v873_v37 = vld [vmem:[#allocation2 + $0x94] ss:$8 sps:$4 sm:$0xff]   ;;  %v876_v39 = vld [vmem:[#allocation2 + $0x90] ss:$8 sps:$4 sm:$0xff]   ;;  %v877_v40 = vld [vmem:[#allocation2 + $0x24] ss:$8 sps:$4 sm:$0xff]  }
  0x34   :  { %446 = vmatpush1.bf16.msra.mxu0 %v828_v7  ;;  %797 = vmatpush1.bf16.msra.mxu1 %v828_v7  ;;  %v879_v41 = vld [vmem:[#allocation2 + $0xa4] ss:$8 sps:$4 sm:$0xff]   ;;  %v881_v42 = vld [vmem:[#allocation2 + $0x20] ss:$8 sps:$4 sm:$0xff]   ;;  %v883_v44 = vld [vmem:[#allocation2 + $0x34] ss:$8 sps:$4 sm:$0xff]  }
  0x35   :  { %447 = vmatprep.subr.bf16.mxu0 %v829_v8  ;;  %782 = vmatprep.subr.bf16.mxu1 %v829_v8  ;;  %v882_v43 = vld [vmem:[#allocation2 + $0xa0] ss:$8 sps:$4 sm:$0xff]   ;;  %v885_v45 = vld [vmem:[#allocation2 + $0xb4] ss:$8 sps:$4 sm:$0xff]   ;;  %v887_v46 = vld [vmem:[#allocation2 + $0x30] ss:$8 sps:$4 sm:$0xff]  }
  0x36   :  { %v888_v47 = vld [vmem:[#allocation2 + $0xb0] ss:$8 sps:$4 sm:$0xff]   ;;  %v889_v48 = vld [vmem:[#allocation2 + $0x44] ss:$8 sps:$4 sm:$0xff]   ;;  %v893_v50 = vld [vmem:[#allocation2 + $0x40] ss:$8 sps:$4 sm:$0xff]  }
  0x37   :  { %v891_v49 = vld [vmem:[#allocation2 + $0xc4] ss:$8 sps:$4 sm:$0xff]   ;;  %v894_v51 = vld [vmem:[#allocation2 + $0xc0] ss:$8 sps:$4 sm:$0xff]   ;;  %v895_v52 = vld [vmem:[#allocation2 + $0x54] ss:$8 sps:$4 sm:$0xff]  }
  0x38   :  { %448 = vmatpush1.bf16.msra.mxu0 %v831_v9  ;;  %798 = vmatpush1.bf16.msra.mxu1 %v831_v9  ;;  %v897_v53 = vld [vmem:[#allocation2 + $0xd4] ss:$8 sps:$4 sm:$0xff]   ;;  %v899_v54 = vld [vmem:[#allocation2 + $0x50] ss:$8 sps:$4 sm:$0xff]   ;;  %v901_v56 = vld [vmem:[#allocation2 + $0x64] ss:$8 sps:$4 sm:$0xff]  }
  0x39   :  { %449 = vmatprep.subr.bf16.mxu0 %v832_v10  ;;  %783 = vmatprep.subr.bf16.mxu1 %v832_v10  ;;  %v900_v55 = vld [vmem:[#allocation2 + $0xd0] ss:$8 sps:$4 sm:$0xff]   ;;  %v903_v57 = vld [vmem:[#allocation2 + $0xe4] ss:$8 sps:$4 sm:$0xff]   ;;  %v905_v58 = vld [vmem:[#allocation2 + $0x60] ss:$8 sps:$4 sm:$0xff]  }
  0x3a   :  { %v906_v59 = vld [vmem:[#allocation2 + $0xe0] ss:$8 sps:$4 sm:$0xff]   ;;  %v907_v60 = vld [vmem:[#allocation2 + $0x74] ss:$8 sps:$4 sm:$0xff]   ;;  %v911_v62 = vld [vmem:[#allocation2 + $0x70] ss:$8 sps:$4 sm:$0xff]  }
  0x3b   :  { %v909_v61 = vld [vmem:[#allocation2 + $0xf4] ss:$8 sps:$4 sm:$0xff]   ;;  %v912_v63 = vld [vmem:[#allocation2 + $0xf0] ss:$8 sps:$4 sm:$0xff]   ;;  %v110_v1 = vshrl.u32 %v109_v0, 7 }
  0x3c   :  { %450 = vmatpush1.bf16.msra.mxu0 %v834_v11  ;;  %799 = vmatpush1.bf16.msra.mxu1 %v834_v11  ;;  %v107_v3 = vld [vmem:[%s1121_s2] sm:$0x3]  ;;  %s989_s2 = smov [#allocation7]  }
  0x3d   :  { %451 = vmatprep.subr.bf16.mxu0 %v835_v12  ;;  %784 = vmatprep.subr.bf16.mxu1 %v835_v12  ;;  %v111_v2 = vsub.s32 0, %v110_v1  ;;  %v115_v4 = vsub.s32 1, %v110_v1  ;;  %s701_s11 = sshll.u32 %s989_s2, 4  ;;  %s702_s11 = int_to_ptr.vmem [resolvable:$true] %s701_s11 }
  0x3e   :  { %s957_s12 = scalar_lea.vmem %s702_s11, 8192  ;;  %p962_p3 = scmp.lt.s32.totalorder %s702_s11, %s702_s11 }
  0x3f   :  { %v1039_v5 = vrot.slane %v107_v3, %v111_v2  ;;  %v1041_v6 = vrot.slane %v107_v3, %v115_v4  ;;  %p958_p2 = scmp.ne.s32.totalorder %s702_s11, %s957_s12  ;;  %p963_p4 = scmp.lt.s32.totalorder %s957_s12, %s957_s12 }
  0x40   :  { %452 = vmatpush1.bf16.msra.mxu0 %v837_v14  ;;  %800 = vmatpush1.bf16.msra.mxu1 %v837_v14 }
  0x41   :  { %453 = vmatprep.subr.bf16.mxu0 %v838_v16  ;;  %785 = vmatprep.subr.bf16.mxu1 %v838_v16  ;;  %p964_p5 = por %p963_p4, %p962_p3 }
  0x43   :  { %p965_p6 = pnand %p964_p5, %p958_p2 }
  0x44   :  { %454 = vmatpush1.bf16.msra.mxu0 %v840_v17  ;;  %801 = vmatpush1.bf16.msra.mxu1 %v840_v17 }
  0x45   :  { %455 = vmatprep.subr.bf16.mxu0 %v841_v18  ;;  %786 = vmatprep.subr.bf16.mxu1 %v841_v18 }
  0x48   :  { %456 = vmatpush1.bf16.msra.mxu0 %v843_v19  ;;  %802 = vmatpush1.bf16.msra.mxu1 %v843_v19 }
  0x49   :  { %457 = vmatprep.subr.bf16.mxu0 %v844_v20  ;;  %787 = vmatprep.subr.bf16.mxu1 %v844_v20 }
  0x4c   :  { %458 = vmatpush1.bf16.msra.mxu0 %v846_v21  ;;  %803 = vmatpush1.bf16.msra.mxu1 %v846_v21 }
  0x4d   :  { %459 = vmatprep.subr.bf16.mxu0 %v847_v22  ;;  %788 = vmatprep.subr.bf16.mxu1 %v847_v22 }
  0x50   :  { %460 = vmatpush1.bf16.msra.mxu0 %v849_v23  ;;  %804 = vmatpush1.bf16.msra.mxu1 %v849_v23 }
  0x51   :  { %461 = vmatprep.subr.bf16.mxu0 %v850_v24  ;;  %789 = vmatprep.subr.bf16.mxu1 %v850_v24 }
  0x54   :  { %462 = vmatpush1.bf16.msra.mxu0 %v852_v25  ;;  %805 = vmatpush1.bf16.msra.mxu1 %v852_v25 }
  0x55   :  { %463 = vmatprep.subr.bf16.mxu0 %v853_v26  ;;  %790 = vmatprep.subr.bf16.mxu1 %v853_v26 }
  0x58   :  { %464 = vmatpush1.bf16.msra.mxu0 %v855_v27  ;;  %806 = vmatpush1.bf16.msra.mxu1 %v855_v27 }
  0x59   :  { %465 = vmatprep.subr.bf16.mxu0 %v856_v28  ;;  %791 = vmatprep.subr.bf16.mxu1 %v856_v28 }
  0x5c   :  { %466 = vmatpush1.bf16.msra.mxu0 %v858_v29  ;;  %807 = vmatpush1.bf16.msra.mxu1 %v858_v29 }
  0x5d   :  { %467 = vmatprep.subr.bf16.mxu0 %v859_v30  ;;  %792 = vmatprep.subr.bf16.mxu1 %v859_v30 }
  0x60   :  { %468 = vmatpush1.bf16.msra.mxu0 %v861_v31  ;;  %808 = vmatpush1.bf16.msra.mxu1 %v861_v31 }
  0x61   :  { %469 = vmatprep.subr.bf16.mxu0 %v862_v32  ;;  %793 = vmatprep.subr.bf16.mxu1 %v862_v32 }
  0x64   :  { %470 = vmatpush1.bf16.msra.mxu0 %v864_v33  ;;  %809 = vmatpush1.bf16.msra.mxu1 %v864_v33 }
  0x67   :  { %472 = vmatmul.mubr.bf16.vlgmr.msra.gmra.mrb[0].mxu0 %v865_v34  ;;  %552 = vmatmul.mubr.bf16.vlgmr.msra.gmra.mrb[0].mxu1 %v868_v35 }
  0x68   :  { %481 = vmatprep.mubr.bf16.mxu0 %v871_v36  ;;  %561 = vmatprep.mubr.bf16.mxu1 %v873_v37 }
  0x6f   :  { %482 = vmatmul.mubr.bf16.gmra.mrb[4].mxu0 %v875_v38  ;;  %562 = vmatmul.mubr.bf16.gmra.mrb[4].mxu1 %v876_v39 }
  0x70   :  { %491 = vmatprep.mubr.bf16.mxu0 %v877_v40  ;;  %571 = vmatprep.mubr.bf16.mxu1 %v879_v41 }
  0x77   :  { %492 = vmatmul.mubr.bf16.gmra.mrb[8].mxu0 %v881_v42  ;;  %572 = vmatmul.mubr.bf16.gmra.mrb[8].mxu1 %v882_v43 }
  0x78   :  { %501 = vmatprep.mubr.bf16.mxu0 %v883_v44  ;;  %581 = vmatprep.mubr.bf16.mxu1 %v885_v45 }
  0x7f   :  { %502 = vmatmul.mubr.bf16.gmra.mrb[12].mxu0 %v887_v46  ;;  %582 = vmatmul.mubr.bf16.gmra.mrb[12].mxu1 %v888_v47 }
  0x80   :  { %511 = vmatprep.mubr.bf16.mxu0 %v889_v48  ;;  %591 = vmatprep.mubr.bf16.mxu1 %v891_v49 }
  0x87   :  { %512 = vmatmul.mubr.bf16.gmra.mrb[16].mxu0 %v893_v50  ;;  %592 = vmatmul.mubr.bf16.gmra.mrb[16].mxu1 %v894_v51 }
  0x88   :  { %521 = vmatprep.mubr.bf16.mxu0 %v895_v52  ;;  %601 = vmatprep.mubr.bf16.mxu1 %v897_v53 }
  0x8f   :  { %522 = vmatmul.mubr.bf16.gmra.mrb[20].mxu0 %v899_v54  ;;  %602 = vmatmul.mubr.bf16.gmra.mrb[20].mxu1 %v900_v55 }
  0x90   :  { %531 = vmatprep.mubr.bf16.mxu0 %v901_v56  ;;  %611 = vmatprep.mubr.bf16.mxu1 %v903_v57 }
  0x97   :  { %532 = vmatmul.mubr.bf16.gmra.mrb[24].mxu0 %v905_v58  ;;  %612 = vmatmul.mubr.bf16.gmra.mrb[24].mxu1 %v906_v59 }
  0x98   :  { %541 = vmatprep.mubr.bf16.mxu0 %v907_v60  ;;  %621 = vmatprep.mubr.bf16.mxu1 %v909_v61 }
  0x9f   :  { %542 = vmatmul.mubr.bf16.gmra.mrb[28].mxu0 %v911_v62  ;;  %622 = vmatmul.mubr.bf16.gmra.mrb[28].mxu1 %v912_v63 }
 0x13a   :  { %v473_v7 = vpop.f32.mrb[0].mxu0  ;;  %v553_v8 = vpop.f32.mrb[0].mxu1 }
 0x13b   :  { %v474_v9 = vadd.f32 %v473_v7, %v1039_v5  ;;  %v554_v10 = vadd.f32 %v553_v8, %v1039_v5  ;;  %v475_v11 = vpop.f32.mrb[1].mxu0  ;;  %v555_v12 = vpop.f32.mrb[1].mxu1 }
 0x13c   :  { %v476_v13 = vadd.f32 %v475_v11, %v1041_v6  ;;  %v556_v14 = vadd.f32 %v555_v12, %v1041_v6  ;;  %v477_v15 = vpop.f32.mrb[2].mxu0  ;;  %v557_v16 = vpop.f32.mrb[2].mxu1 }
 0x13d   :  { %632 = vst [vmem:[#allocation7] sm:$0xff] %v474_v9  ;;  %664 = vst [vmem:[#allocation7 + $0x100] sm:$0xff] %v554_v10  ;;  %v478_v17 = vadd.f32 %v477_v15, %v1039_v5  ;;  %v558_v18 = vadd.f32 %v557_v16, %v1039_v5  ;;  %v479_v19 = vpop.f32.mrb[3].mxu0  ;;  %v559_v20 = vpop.f32.mrb[3].mxu1 }
 0x13e   :  { %633 = vst [vmem:[#allocation7 + $0x8] sm:$0xff] %v476_v13  ;;  %665 = vst [vmem:[#allocation7 + $0x108] sm:$0xff] %v556_v14  ;;  %v480_v21 = vadd.f32 %v479_v19, %v1041_v6  ;;  %v560_v22 = vadd.f32 %v559_v20, %v1041_v6 }
 0x13f   :  { %634 = vst [vmem:[#allocation7 + $0x10] sm:$0xff] %v478_v17  ;;  %666 = vst [vmem:[#allocation7 + $0x110] sm:$0xff] %v558_v18 }
 0x140   :  { %635 = vst [vmem:[#allocation7 + $0x18] sm:$0xff] %v480_v21  ;;  %667 = vst [vmem:[#allocation7 + $0x118] sm:$0xff] %v560_v22 }
 0x142   :  { %v483_v23 = vpop.f32.mrb[4].mxu0  ;;  %v563_v24 = vpop.f32.mrb[4].mxu1 }
 0x143   :  { %v484_v25 = vadd.f32 %v483_v23, %v1039_v5  ;;  %v564_v26 = vadd.f32 %v563_v24, %v1039_v5  ;;  %v485_v27 = vpop.f32.mrb[5].mxu0  ;;  %v565_v28 = vpop.f32.mrb[5].mxu1 }
 0x144   :  { %v486_v29 = vadd.f32 %v485_v27, %v1041_v6  ;;  %v566_v30 = vadd.f32 %v565_v28, %v1041_v6  ;;  %v487_v31 = vpop.f32.mrb[6].mxu0  ;;  %v567_v32 = vpop.f32.mrb[6].mxu1 }
 0x145   :  { %636 = vst [vmem:[#allocation7 + $0x20] sm:$0xff] %v484_v25  ;;  %668 = vst [vmem:[#allocation7 + $0x120] sm:$0xff] %v564_v26  ;;  %v488_v33 = vadd.f32 %v487_v31, %v1039_v5  ;;  %v568_v34 = vadd.f32 %v567_v32, %v1039_v5  ;;  %v489_v35 = vpop.f32.mrb[7].mxu0  ;;  %v569_v36 = vpop.f32.mrb[7].mxu1 }
 0x146   :  { %637 = vst [vmem:[#allocation7 + $0x28] sm:$0xff] %v486_v29  ;;  %669 = vst [vmem:[#allocation7 + $0x128] sm:$0xff] %v566_v30  ;;  %v490_v37 = vadd.f32 %v489_v35, %v1041_v6  ;;  %v570_v38 = vadd.f32 %v569_v36, %v1041_v6 }
 0x147   :  { %638 = vst [vmem:[#allocation7 + $0x30] sm:$0xff] %v488_v33  ;;  %670 = vst [vmem:[#allocation7 + $0x130] sm:$0xff] %v568_v34 }
 0x148   :  { %639 = vst [vmem:[#allocation7 + $0x38] sm:$0xff] %v490_v37  ;;  %671 = vst [vmem:[#allocation7 + $0x138] sm:$0xff] %v570_v38 }
 0x14a   :  { %v493_v39 = vpop.f32.mrb[8].mxu0  ;;  %v573_v40 = vpop.f32.mrb[8].mxu1 }
 0x14b   :  { %v494_v41 = vadd.f32 %v493_v39, %v1039_v5  ;;  %v574_v42 = vadd.f32 %v573_v40, %v1039_v5  ;;  %v495_v43 = vpop.f32.mrb[9].mxu0  ;;  %v575_v44 = vpop.f32.mrb[9].mxu1 }
 0x14c   :  { %v496_v45 = vadd.f32 %v495_v43, %v1041_v6  ;;  %v576_v46 = vadd.f32 %v575_v44, %v1041_v6  ;;  %v497_v47 = vpop.f32.mrb[10].mxu0  ;;  %v577_v48 = vpop.f32.mrb[10].mxu1 }
 0x14d   :  { %640 = vst [vmem:[#allocation7 + $0x40] sm:$0xff] %v494_v41  ;;  %672 = vst [vmem:[#allocation7 + $0x140] sm:$0xff] %v574_v42  ;;  %v498_v49 = vadd.f32 %v497_v47, %v1039_v5  ;;  %v578_v50 = vadd.f32 %v577_v48, %v1039_v5  ;;  %v499_v51 = vpop.f32.mrb[11].mxu0  ;;  %v579_v52 = vpop.f32.mrb[11].mxu1 }
 0x14e   :  { %641 = vst [vmem:[#allocation7 + $0x48] sm:$0xff] %v496_v45  ;;  %673 = vst [vmem:[#allocation7 + $0x148] sm:$0xff] %v576_v46  ;;  %v500_v53 = vadd.f32 %v499_v51, %v1041_v6  ;;  %v580_v54 = vadd.f32 %v579_v52, %v1041_v6 }
 0x14f   :  { %642 = vst [vmem:[#allocation7 + $0x50] sm:$0xff] %v498_v49  ;;  %674 = vst [vmem:[#allocation7 + $0x150] sm:$0xff] %v578_v50 }
 0x150   :  { %643 = vst [vmem:[#allocation7 + $0x58] sm:$0xff] %v500_v53  ;;  %675 = vst [vmem:[#allocation7 + $0x158] sm:$0xff] %v580_v54 }
 0x152   :  { %v503_v55 = vpop.f32.mrb[12].mxu0  ;;  %v583_v56 = vpop.f32.mrb[12].mxu1 }
 0x153   :  { %v504_v57 = vadd.f32 %v503_v55, %v1039_v5  ;;  %v584_v58 = vadd.f32 %v583_v56, %v1039_v5  ;;  %v505_v59 = vpop.f32.mrb[13].mxu0  ;;  %v585_v60 = vpop.f32.mrb[13].mxu1 }
 0x154   :  { %v506_v61 = vadd.f32 %v505_v59, %v1041_v6  ;;  %v586_v62 = vadd.f32 %v585_v60, %v1041_v6  ;;  %v507_v63 = vpop.f32.mrb[14].mxu0  ;;  %v587_v0 = vpop.f32.mrb[14].mxu1 }
 0x155   :  { %644 = vst [vmem:[#allocation7 + $0x60] sm:$0xff] %v504_v57  ;;  %676 = vst [vmem:[#allocation7 + $0x160] sm:$0xff] %v584_v58  ;;  %v508_v1 = vadd.f32 %v507_v63, %v1039_v5  ;;  %v588_v2 = vadd.f32 %v587_v0, %v1039_v5  ;;  %v509_v3 = vpop.f32.mrb[15].mxu0  ;;  %v589_v4 = vpop.f32.mrb[15].mxu1 }
 0x156   :  { %645 = vst [vmem:[#allocation7 + $0x68] sm:$0xff] %v506_v61  ;;  %677 = vst [vmem:[#allocation7 + $0x168] sm:$0xff] %v586_v62  ;;  %v510_v7 = vadd.f32 %v509_v3, %v1041_v6  ;;  %v590_v8 = vadd.f32 %v589_v4, %v1041_v6 }
 0x157   :  { %646 = vst [vmem:[#allocation7 + $0x70] sm:$0xff] %v508_v1  ;;  %678 = vst [vmem:[#allocation7 + $0x170] sm:$0xff] %v588_v2 }
 0x158   :  { %647 = vst [vmem:[#allocation7 + $0x78] sm:$0xff] %v510_v7  ;;  %679 = vst [vmem:[#allocation7 + $0x178] sm:$0xff] %v590_v8 }
 0x15a   :  { %v513_v9 = vpop.f32.mrb[16].mxu0  ;;  %v593_v10 = vpop.f32.mrb[16].mxu1 }
 0x15b   :  { %v514_v11 = vadd.f32 %v513_v9, %v1039_v5  ;;  %v594_v12 = vadd.f32 %v593_v10, %v1039_v5  ;;  %v515_v13 = vpop.f32.mrb[17].mxu0  ;;  %v595_v14 = vpop.f32.mrb[17].mxu1 }
 0x15c   :  { %v516_v15 = vadd.f32 %v515_v13, %v1041_v6  ;;  %v596_v16 = vadd.f32 %v595_v14, %v1041_v6  ;;  %v517_v17 = vpop.f32.mrb[18].mxu0  ;;  %v597_v18 = vpop.f32.mrb[18].mxu1 }
 0x15d   :  { %648 = vst [vmem:[#allocation7 + $0x80] sm:$0xff] %v514_v11  ;;  %680 = vst [vmem:[#allocation7 + $0x180] sm:$0xff] %v594_v12  ;;  %v518_v19 = vadd.f32 %v517_v17, %v1039_v5  ;;  %v598_v20 = vadd.f32 %v597_v18, %v1039_v5  ;;  %v519_v21 = vpop.f32.mrb[19].mxu0  ;;  %v599_v22 = vpop.f32.mrb[19].mxu1 }
 0x15e   :  { %649 = vst [vmem:[#allocation7 + $0x88] sm:$0xff] %v516_v15  ;;  %681 = vst [vmem:[#allocation7 + $0x188] sm:$0xff] %v596_v16  ;;  %v520_v23 = vadd.f32 %v519_v21, %v1041_v6  ;;  %v600_v24 = vadd.f32 %v599_v22, %v1041_v6 }
 0x15f   :  { %650 = vst [vmem:[#allocation7 + $0x90] sm:$0xff] %v518_v19  ;;  %682 = vst [vmem:[#allocation7 + $0x190] sm:$0xff] %v598_v20 }
 0x160   :  { %651 = vst [vmem:[#allocation7 + $0x98] sm:$0xff] %v520_v23  ;;  %683 = vst [vmem:[#allocation7 + $0x198] sm:$0xff] %v600_v24 }
 0x162   :  { %v523_v25 = vpop.f32.mrb[20].mxu0  ;;  %v603_v26 = vpop.f32.mrb[20].mxu1 }
 0x163   :  { %v524_v27 = vadd.f32 %v523_v25, %v1039_v5  ;;  %v604_v28 = vadd.f32 %v603_v26, %v1039_v5  ;;  %v525_v29 = vpop.f32.mrb[21].mxu0  ;;  %v605_v30 = vpop.f32.mrb[21].mxu1 }
 0x164   :  { %v526_v31 = vadd.f32 %v525_v29, %v1041_v6  ;;  %v606_v32 = vadd.f32 %v605_v30, %v1041_v6  ;;  %v527_v33 = vpop.f32.mrb[22].mxu0  ;;  %v607_v34 = vpop.f32.mrb[22].mxu1 }
 0x165   :  { %652 = vst [vmem:[#allocation7 + $0xa0] sm:$0xff] %v524_v27  ;;  %684 = vst [vmem:[#allocation7 + $0x1a0] sm:$0xff] %v604_v28  ;;  %v528_v35 = vadd.f32 %v527_v33, %v1039_v5  ;;  %v608_v36 = vadd.f32 %v607_v34, %v1039_v5  ;;  %v529_v37 = vpop.f32.mrb[23].mxu0  ;;  %v609_v38 = vpop.f32.mrb[23].mxu1 }
 0x166   :  { %653 = vst [vmem:[#allocation7 + $0xa8] sm:$0xff] %v526_v31  ;;  %685 = vst [vmem:[#allocation7 + $0x1a8] sm:$0xff] %v606_v32  ;;  %v530_v39 = vadd.f32 %v529_v37, %v1041_v6  ;;  %v610_v40 = vadd.f32 %v609_v38, %v1041_v6 }
 0x167   :  { %654 = vst [vmem:[#allocation7 + $0xb0] sm:$0xff] %v528_v35  ;;  %686 = vst [vmem:[#allocation7 + $0x1b0] sm:$0xff] %v608_v36 }
 0x168   :  { %655 = vst [vmem:[#allocation7 + $0xb8] sm:$0xff] %v530_v39  ;;  %687 = vst [vmem:[#allocation7 + $0x1b8] sm:$0xff] %v610_v40 }
 0x16a   :  { %v533_v41 = vpop.f32.mrb[24].mxu0  ;;  %v613_v42 = vpop.f32.mrb[24].mxu1 }
 0x16b   :  { %v534_v43 = vadd.f32 %v533_v41, %v1039_v5  ;;  %v614_v44 = vadd.f32 %v613_v42, %v1039_v5  ;;  %v535_v45 = vpop.f32.mrb[25].mxu0  ;;  %v615_v46 = vpop.f32.mrb[25].mxu1 }
 0x16c   :  { %v536_v47 = vadd.f32 %v535_v45, %v1041_v6  ;;  %v616_v48 = vadd.f32 %v615_v46, %v1041_v6  ;;  %v537_v49 = vpop.f32.mrb[26].mxu0  ;;  %v617_v50 = vpop.f32.mrb[26].mxu1 }
 0x16d   :  { %656 = vst [vmem:[#allocation7 + $0xc0] sm:$0xff] %v534_v43  ;;  %688 = vst [vmem:[#allocation7 + $0x1c0] sm:$0xff] %v614_v44  ;;  %v538_v51 = vadd.f32 %v537_v49, %v1039_v5  ;;  %v618_v52 = vadd.f32 %v617_v50, %v1039_v5  ;;  %v539_v53 = vpop.f32.mrb[27].mxu0  ;;  %v619_v54 = vpop.f32.mrb[27].mxu1 }
 0x16e   :  { %657 = vst [vmem:[#allocation7 + $0xc8] sm:$0xff] %v536_v47  ;;  %689 = vst [vmem:[#allocation7 + $0x1c8] sm:$0xff] %v616_v48  ;;  %v540_v55 = vadd.f32 %v539_v53, %v1041_v6  ;;  %v620_v56 = vadd.f32 %v619_v54, %v1041_v6 }
 0x16f   :  { %658 = vst [vmem:[#allocation7 + $0xd0] sm:$0xff] %v538_v51  ;;  %690 = vst [vmem:[#allocation7 + $0x1d0] sm:$0xff] %v618_v52 }
 0x170   :  { %659 = vst [vmem:[#allocation7 + $0xd8] sm:$0xff] %v540_v55  ;;  %691 = vst [vmem:[#allocation7 + $0x1d8] sm:$0xff] %v620_v56 }
 0x172   :  { %v543_v57 = vpop.f32.mrb[28].mxu0  ;;  %v623_v58 = vpop.f32.mrb[28].mxu1 }
 0x173   :  { %v544_v59 = vadd.f32 %v543_v57, %v1039_v5  ;;  %v624_v60 = vadd.f32 %v623_v58, %v1039_v5  ;;  %v545_v61 = vpop.f32.mrb[29].mxu0  ;;  %v625_v62 = vpop.f32.mrb[29].mxu1 }
 0x174   :  { %v546_v63 = vadd.f32 %v545_v61, %v1041_v6  ;;  %v626_v0 = vadd.f32 %v625_v62, %v1041_v6  ;;  %v547_v1 = vpop.f32.mrb[30].mxu0  ;;  %v627_v2 = vpop.f32.mrb[30].mxu1 }
 0x175   :  { %660 = vst [vmem:[#allocation7 + $0xe0] sm:$0xff] %v544_v59  ;;  %692 = vst [vmem:[#allocation7 + $0x1e0] sm:$0xff] %v624_v60  ;;  %v548_v3 = vadd.f32 %v547_v1, %v1039_v5  ;;  %v628_v4 = vadd.f32 %v627_v2, %v1039_v5  ;;  %v549_v7 = vpop.f32.mrb[31].mxu0  ;;  %v629_v8 = vpop.f32.mrb[31].mxu1 }
 0x176   :  { %661 = vst [vmem:[#allocation7 + $0xe8] sm:$0xff] %v546_v63  ;;  %693 = vst [vmem:[#allocation7 + $0x1e8] sm:$0xff] %v626_v0  ;;  %v550_v9 = vadd.f32 %v549_v7, %v1041_v6  ;;  %v630_v10 = vadd.f32 %v629_v8, %v1041_v6 }
 0x177   :  { %662 = vst [vmem:[#allocation7 + $0xf0] sm:$0xff] %v548_v3  ;;  %694 = vst [vmem:[#allocation7 + $0x1f0] sm:$0xff] %v628_v4 }
 0x178   :  { %663 = vst [vmem:[#allocation7 + $0xf8] sm:$0xff] %v550_v9  ;;  %695 = vst [vmem:[#allocation7 + $0x1f8] sm:$0xff] %v630_v10 }
 0x179   :  { %968 = shalt.err (!%p965_p6)
}
 0x17a   :  { %s969_s15 = scalar_lea.hbm %s1122_s3, 8192 }
 0x17b   :  { %p970_p7 = scmp.ne.s32.totalorder %s1122_s3, %s969_s15  ;;  %p973_p8 = scmp.lt.u32.totalorder %s969_s15, %s1122_s3 }
 0x17d   :  { %p975_p9 = pnand %p973_p8, %p970_p7 }
 0x17f   :  { %978 = shalt.err (!%p975_p9)
}
 0x180   :  { %s990_s20 = smov 256   ;;  %s991_s21 = smov 16  }
 0x181   :  { %707 = dma.vmem_to_hbm [thread:$0]  %s702_s11, 8192, %s1122_s3, [#allocation4], %s990_s20, %s990_s20, %s991_s21  }
 0x182   :  { %983 = dma.done.wait [#allocation4], 8192  }
 0x183   :  { %984 = vsyncadd [#allocation4], 4294959104 }
 0x184   :  { %711 = vsyncpa [#allocation3], 1 }
 0x185   :  { %712 = vsyncpa [#allocation6], 1 }
 0x186   :  { %713 = vsyncpa [#allocation4], 1 }

</bundles_post_ra>
